<compile_context>
chip_gen: v7x
topology: tpu7x:2x2x1
jax: 0.10.0
libtpu: 0.0.40
codegen_flags: <defaults>
</compile_context>

<pallas_src>
import functools
import math

import jax
import jax.numpy as jnp
from jax.experimental import pallas as pl
from jax.experimental.pallas import tpu as pltpu


def _rotary_kernel(inv_ref, off_ref, out_ref, *, fold):
    # inv_ref: (1, W) f32  = tile(concat([inv_freq, inv_freq]), fold)
    # off_ref: (1, W) f32  = per-lane sub-row seq offset (lane // dim), 0s if fold==1
    # out_ref: (R, W) f32  = `fold` consecutive seq rows packed per output row
    i = pl.program_id(0)
    block_rows, width = out_ref.shape
    row = jax.lax.broadcasted_iota(jnp.int32, (block_rows, width), 0)
    # Global seq position for every element (exact in f32 for realistic S).
    pos = (i * block_rows + row).astype(jnp.float32) * float(fold) + off_ref[...]
    out_ref[...] = pos * inv_ref[...]


def rotary_embedding(max_seq_len: int, dim: int, *, target_block_bytes: int = 1 << 20):
    assert dim % 2 == 0, "dim must be even"
    half = dim // 2

    # Deterministic "parameter" construction, matching the module's __init__.
    inv_freq = 1.0 / (10000.0 ** (jnp.arange(0, dim, 2, dtype=jnp.float32) / dim))  # (half,)
    inv_cat = jnp.concatenate([inv_freq, inv_freq])                                  # (dim,)

    # Lane-dense folding factor: smallest power-of-two k with (k*dim) % 128 == 0.
    fold = 128 // math.gcd(dim, 128)
    if max_seq_len % fold != 0:
        fold = 1  # fall back to direct layout (still correct; stores just masked)
    width = fold * dim
    rows_total = max_seq_len // fold

    inv_full = jnp.tile(inv_cat, fold).reshape(1, width)                             # (1, W)
    lane_off = (jnp.arange(width, dtype=jnp.int32) // dim).astype(jnp.float32)
    lane_off = lane_off.reshape(1, width)                                            # (1, W)

    # Block rows sized for ~1 MiB per block (x2 double-buffering) -> v7x-safe,
    # large enough to amortize per-grid-step overhead on v5e.
    rows_per_block = max(8, (target_block_bytes // (width * 4)) // 8 * 8)
    rows_per_block = min(rows_per_block, rows_total)
    grid = (pl.cdiv(rows_total, rows_per_block),)

    kernel = functools.partial(_rotary_kernel, fold=fold)
    out_folded = pl.pallas_call(
        kernel,
        out_shape=jax.ShapeDtypeStruct((rows_total, width), jnp.float32),
        grid=grid,
        in_specs=[
            pl.BlockSpec((1, width), lambda i: (0, 0)),
            pl.BlockSpec((1, width), lambda i: (0, 0)),
        ],
        out_specs=pl.BlockSpec((rows_per_block, width), lambda i: (i, 0)),
        compiler_params=pltpu.CompilerParams(dimension_semantics=("parallel",)),
    )(inv_full, lane_off)

    # Zero-copy row-major reinterpretation back to the module's (S, dim) layout.
    return out_folded.reshape(max_seq_len, dim)


def rotary_embedding_ref(max_seq_len: int, dim: int):
    inv_freq = 1.0 / (10000.0 ** (jnp.arange(0, dim, 2, dtype=jnp.float32) / dim))
    seq = jnp.arange(max_seq_len, dtype=jnp.float32)
    freqs = jnp.einsum("i,j->ij", seq, inv_freq)
    return jnp.concatenate([freqs, freqs], axis=-1)


if __name__ == "__main__":
    # The module's forward takes only `max_seq_len` (no tensor inputs); the PRNG
    # key is unused for input construction, kept for convention.
    _ = jax.random.PRNGKey(0)

    # Small shape implied by the module's forward.
    max_seq_len, dim = 8, 32
    out = jax.block_until_ready(rotary_embedding(max_seq_len, dim))
    ref = rotary_embedding_ref(max_seq_len, dim)
    assert out.shape == (max_seq_len, dim)
    assert out.dtype == jnp.float32
    assert jnp.allclose(out, ref, atol=1e-6, rtol=1e-6)

    # Exercise the tiled multi-block path, the folded lane-dense path, and the
    # direct (non-foldable) fallback path.
    for s, d in [(4096, 256), (2048, 64), (1000, 50)]:
        o = jax.block_until_ready(rotary_embedding(s, d))
        r = rotary_embedding_ref(s, d)
        assert o.shape == r.shape
        assert jnp.allclose(o, r, atol=1e-5, rtol=1e-5), (s, d)

    print("KERNEL_OK")
</pallas_src>

<mosaic_0001>
module attributes {stable_mosaic.version = 11 : i64} {
  func.func @_rotary_kernel(%arg0: i32, %arg1: memref<1x128xf32, #tpu.memory_space<vmem>>, %arg2: memref<1x128xf32, #tpu.memory_space<vmem>>, %arg3: memref<2x128xf32, #tpu.memory_space<vmem>>) attributes {dimension_semantics = [#tpu.dimension_semantics<parallel>], iteration_bounds = array<i64: 1>, scalar_prefetch = 0 : i64, scratch_operands = 0 : i64, tpu.core_type = #tpu.core_type<tc>, window_params = [{pipeline_mode = #tpu.pipeline_mode<synchronous>, transform_indices = @transform_0, window_bounds = array<i64: 1, 128>}, {pipeline_mode = #tpu.pipeline_mode<synchronous>, transform_indices = @transform_1, window_bounds = array<i64: 1, 128>}, {transform_indices = @transform_2, window_bounds = array<i64: 2, 128>}]} {
    %0 = tpu.iota {dimensions = array<i32: 0>} : vector<2x128xi32>
    %c2_i32 = arith.constant 2 : i32
    %1 = arith.muli %arg0, %c2_i32 : i32
    %2 = vector.broadcast %1 : i32 to vector<2x128xi32>
    %3 = arith.addi %2, %0 : vector<2x128xi32>
    %4 = arith.sitofp %3 : vector<2x128xi32> to vector<2x128xf32>
    %cst = arith.constant 4.000000e+00 : f32
    %5 = vector.broadcast %cst : f32 to vector<2x128xf32>
    %6 = arith.mulf %4, %5 : vector<2x128xf32>
    %c0 = arith.constant 0 : index
    %c0_0 = arith.constant 0 : index
    %7 = vector.load %arg2[%c0, %c0_0] : memref<1x128xf32, #tpu.memory_space<vmem>>, vector<1x128xf32>
    %8 = vector.broadcast %7 : vector<1x128xf32> to vector<2x128xf32>
    %9 = arith.addf %6, %8 : vector<2x128xf32>
    %c0_1 = arith.constant 0 : index
    %c0_2 = arith.constant 0 : index
    %10 = vector.load %arg1[%c0_1, %c0_2] : memref<1x128xf32, #tpu.memory_space<vmem>>, vector<1x128xf32>
    %11 = vector.broadcast %10 : vector<1x128xf32> to vector<2x128xf32>
    %12 = arith.mulf %9, %11 : vector<2x128xf32>
    %c0_3 = arith.constant 0 : index
    %c0_4 = arith.constant 0 : index
    %13 = vector.load %arg3[%c0_3, %c0_4] : memref<2x128xf32, #tpu.memory_space<vmem>>, vector<2x128xf32>
    tpu.vector_store %arg3[%c0_3, %c0_4], %12 {strides = array<i32>} : memref<2x128xf32, #tpu.memory_space<vmem>>, vector<2x128xf32>,
    return
  }
  func.func @transform_0(%arg0: i32) -> (i32, i32) {
    %c0_i32 = arith.constant 0 : i32
    %c0_i32_0 = arith.constant 0 : i32
    %c0_i32_1 = arith.constant 0 : i32
    return %c0_i32, %c0_i32_0 : i32, i32
  }
  func.func @transform_1(%arg0: i32) -> (i32, i32) {
    %c0_i32 = arith.constant 0 : i32
    %c0_i32_0 = arith.constant 0 : i32
    %c0_i32_1 = arith.constant 0 : i32
    return %c0_i32, %c0_i32_0 : i32, i32
  }
  func.func @transform_2(%arg0: i32) -> (i32, i32) {
    %c0_i32 = arith.constant 0 : i32
    %c0_i32_0 = arith.constant 0 : i32
    return %arg0, %c0_i32 : i32, i32
  }
}

</mosaic_0001>

<bundles_post_ra>
// kernel: tpu_custom_call.1
= control target key start
LH: loop header
LB: loop body
LE: loop exit
PB: predicated region body
PF: predicated region fallthrough
CT: control target
= control target key end

     0   :  { %7 = vsyncpa [#allocation3], 0  ;;  %s159_s0 = inlined_call_operand.hbm [shape: f32[1,128], index: 0, kind: input, shape index: {}]   ;;  %s160_s1 = inlined_call_operand.vmem [shape: f32[1,128], index: 1, kind: input, shape index: {}]   ;;  %s161_s2 = inlined_call_operand.hbm [shape: f32[2,128], index: 2, kind: output, shape index: {}]  }
   0x1   :  { %8 = vsyncpa [#allocation4], 0  ;;  %s115_s9 = smov [#allocation2]   ;;  %s67_s13 = scalar_lea.hbm %s159_s0, 16 }
   0x2   :  { %s15_s10 = sshll.u32 %s115_s9, 4  ;;  %p68_p0 = scmp.ne.s32.totalorder %s159_s0, %s67_s13  ;;  %s16_s10 = int_to_ptr.vmem [resolvable:$true] %s15_s10 }
   0x3   :  { %p71_p1 = scmp.lt.u32.totalorder %s67_s13, %s159_s0 }
   0x5   :  { %p73_p2 = pnand %p71_p1, %p68_p0 }
   0x7   :  { %76 = shalt.err (!%p73_p2)
}
   0x8   :  { %s77_s18 = scalar_lea.vmem %s16_s10, 16  ;;  %s81_s19 = scalar_lea.vmem %s16_s10, 32 }
   0x9   :  { %p78_p3 = scmp.ne.s32.totalorder %s16_s10, %s77_s18  ;;  %p82_p4 = scmp.lt.s32.totalorder %s16_s10, %s16_s10 }
   0xa   :  { %p83_p5 = scmp.lt.s32.totalorder %s81_s19, %s77_s18 }
   0xc   :  { %p84_p6 = por %p83_p5, %p82_p4 }
   0xe   :  { %p85_p7 = pnand %p84_p6, %p78_p3 }
  0x10   :  { %88 = shalt.err (!%p85_p7)
}
  0x11   :  { %18 = dma.hbm_to_vmem [thread:$0]  %s159_s0, 16, %s16_s10, [#allocation3]  }
  0x12   :  { %111 = dma.done.wait [#allocation3], 16  }
  0x13   :  { %112 = vsyncadd [#allocation3], 4294967280  ;;  %v24_v0 = vlaneseq  ;;  %v63_v4 = vld [vmem:[%s160_s1] ss:$0 sm:$0xff]  ;;  %s116_s24 = smov [#allocation5]  }
  0x14   :  { %v64_v5 = vld [vmem:[#allocation2] ss:$0 sm:$0xff]  ;;  %s54_s25 = sshll.u32 %s116_s24, 4  ;;  %s55_s25 = int_to_ptr.vmem [resolvable:$true] %s54_s25 }
  0x15   :  { %v25_v1 = vshrl.u32 %v24_v0, 7  ;;  %s89_s26 = scalar_lea.vmem %s55_s25, 32  ;;  %p94_p9 = scmp.lt.s32.totalorder %s55_s25, %s55_s25 }
  0x16   :  { %p90_p8 = scmp.ne.s32.totalorder %s55_s25, %s89_s26  ;;  %p95_p10 = scmp.lt.s32.totalorder %s89_s26, %s89_s26 }
  0x17   :  { %v29_v2 = vcvt.s32.f32 %v25_v1 }
  0x18   :  { %p96_p11 = por %p95_p10, %p94_p9 }
  0x19   :  { %v30_v3 = vmul.f32 4.0, %v29_v2 }
  0x1a   :  { %p97_p12 = pnand %p96_p11, %p90_p8 }
  0x1b   :  { %v38_v6 = vadd.f32 %v63_v4, %v30_v3 }
  0x1d   :  { %v46_v7 = vmul.f32 %v64_v5, %v38_v6 }
  0x1f   :  { %47 = vst [vmem:[#allocation5] sm:$0x3] %v46_v7 }
  0x20   :  { %100 = shalt.err (!%p97_p12)
}
  0x21   :  { %s101_s28 = scalar_lea.hbm %s161_s2, 32 }
  0x22   :  { %p102_p13 = scmp.ne.s32.totalorder %s161_s2, %s101_s28  ;;  %p105_p0 = scmp.lt.u32.totalorder %s101_s28, %s161_s2 }
  0x24   :  { %p107_p1 = pnand %p105_p0, %p102_p13 }
  0x26   :  { %110 = shalt.err (!%p107_p1)
}
  0x27   :  { %57 = dma.vmem_to_hbm [thread:$0]  %s55_s25, 32, %s161_s2, [#allocation4]  }
  0x28   :  { %113 = dma.done.wait [#allocation4], 32  }
  0x29   :  { %114 = vsyncadd [#allocation4], 4294967264 }
  0x2a   :  { %61 = vsyncpa [#allocation3], 1 }
  0x2b   :  { %62 = vsyncpa [#allocation4], 1 }

</bundles_post_ra>
